<compile_context>
chip_gen: v6e
topology: v6e:2x2x1
jax: 0.10.0
libtpu: 0.0.40
codegen_flags: <defaults>
</compile_context>

<pallas_src>
import functools

import jax
import jax.numpy as jnp
from jax.experimental import pallas as pl
from jax.experimental.pallas import tpu as pltpu


def _round_up(x: int, m: int) -> int:
    return ((x + m - 1) // m) * m


def _linear_kernel_direct(x_ref, w_ref, b_ref, o_ref):
    """float32 output: accumulate directly into the K-resident output block.

    x_ref: (tm, tk) bf16 | w_ref: (tk, tn) bf16 | b_ref: (1, tn) f32 | o_ref: (tm, tn) f32
    """
    k = pl.program_id(2)

    @pl.when(k == 0)
    def _init():
        o_ref[...] = jnp.zeros_like(o_ref)

    o_ref[...] += jnp.dot(x_ref[...], w_ref[...],
                          preferred_element_type=jnp.float32)

    @pl.when(k == pl.num_programs(2) - 1)
    def _epilogue():
        o_ref[...] += b_ref[...]


def _linear_kernel_acc(x_ref, w_ref, b_ref, o_ref, acc_ref):
    """Non-f32 output: f32 scratch accumulator, single cast in the epilogue."""
    k = pl.program_id(2)

    @pl.when(k == 0)
    def _init():
        acc_ref[...] = jnp.zeros_like(acc_ref)

    acc_ref[...] += jnp.dot(x_ref[...], w_ref[...],
                            preferred_element_type=jnp.float32)

    @pl.when(k == pl.num_programs(2) - 1)
    def _epilogue():
        o_ref[...] = (acc_ref[...] + b_ref[...]).astype(o_ref.dtype)


def prepare_linear_params(weight, bias, *, tn=512, tk=1024,
                          param_dtype=jnp.bfloat16):
    """One-time parameter conversion (call once at load time, NOT per forward).

    Transposes the PyTorch (N, K) weight to (K, N), zero-pads to tile-aligned
    shapes, and casts to the MXU-native compute dtype.  Bias stays in f32.
    Returns (w_padded, b_padded, meta) where meta holds the static tile sizes.
    """
    N, K = weight.shape
    tn = min(tn, _round_up(N, 128))
    tk = min(tk, _round_up(K, 128))
    Np = _round_up(N, tn)
    Kp = _round_up(K, tk)

    w = jnp.asarray(weight).T                      # (K, N): plain dot in-kernel
    w = jnp.pad(w, ((0, Kp - K), (0, Np - N))).astype(param_dtype)
    b = jnp.pad(jnp.asarray(bias, jnp.float32).reshape(1, N),
                ((0, 0), (0, Np - N)))
    meta = dict(tn=int(tn), tk=int(tk), n_out=int(N), k_in=int(K))
    return w, b, meta


@functools.partial(jax.jit, static_argnames=("tn", "tk", "n_out", "k_in"))
def vision_encoder_forward(x, w_padded, b_padded, *, tn, tk, n_out, k_in):
    """y = x @ weight.T + bias with pre-converted params from prepare_linear_params.

    x: (..., k_in); w_padded: (Kp, Np) compute-dtype; b_padded: (1, Np) f32.
    """
    orig_shape = x.shape
    assert orig_shape[-1] == k_in, f"in_features mismatch: {orig_shape[-1]} vs {k_in}"
    out_dtype = x.dtype
    compute_dtype = w_padded.dtype

    Kp, Np = w_padded.shape
    x2 = x.reshape(-1, k_in)
    M = x2.shape[0]

    # Activation tile: sublane-aligned, VMEM-filling but capped at 512 rows.
    sub = 16 if compute_dtype == jnp.bfloat16 else 8
    tm = min(512, _round_up(M, sub))
    Mp = _round_up(M, tm)

    # Only the (cheap, per-call) activation is cast/padded in the hot path.
    x2 = x2.astype(compute_dtype)
    if (Mp, Kp) != (M, k_in):
        x2 = jnp.pad(x2, ((0, Mp - M), (0, Kp - k_in)))

    grid = (Mp // tm, Np // tn, Kp // tk)

    bx = jnp.dtype(compute_dtype).itemsize
    bo = jnp.dtype(out_dtype).itemsize
    cost = pl.CostEstimate(
        flops=2 * Mp * Np * Kp,
        transcendentals=0,
        bytes_accessed=(Mp * Kp * bx) * (Np // tn)     # x re-streamed per N tile
        + (Kp * Np * bx) * (Mp // tm)                  # w re-streamed per M tile
        + Mp * Np * bo,                                # output written once
    )

    in_specs = [
        pl.BlockSpec((tm, tk), lambda i, j, k: (i, k)),   # x tile
        pl.BlockSpec((tk, tn), lambda i, j, k: (k, j)),   # weight tile (K, N)
        pl.BlockSpec((1, tn), lambda i, j, k: (0, j)),    # bias row tile
    ]
    out_spec = pl.BlockSpec((tm, tn), lambda i, j, k: (i, j))

    direct = out_dtype == jnp.float32
    kernel = _linear_kernel_direct if direct else _linear_kernel_acc
    scratch = () if direct else (pltpu.VMEM((tm, tn), jnp.float32),)

    out_padded = pl.pallas_call(
        kernel,
        out_shape=jax.ShapeDtypeStruct((Mp, Np), out_dtype),
        grid_spec=pltpu.PrefetchScalarGridSpec(
            num_scalar_prefetch=0,
            grid=grid,
            in_specs=in_specs,
            out_specs=out_spec,
            scratch_shapes=scratch,
        ),
        compiler_params=pltpu.CompilerParams(
            dimension_semantics=("parallel", "parallel", "arbitrary"),
            vmem_limit_bytes=48 * 1024 * 1024,   # fits v7x (64 MiB) and raises v5e/v6e default
        ),
        cost_estimate=cost,
    )(x2, w_padded, b_padded)

    y = out_padded[:M, :n_out]
    return y.reshape(*orig_shape[:-1], n_out)


if __name__ == "__main__":
    # Small shapes consistent with VisionEncoder(input_size, hidden_size).
    batch = 8
    input_size = 32
    hidden_size = 64

    key = jax.random.PRNGKey(0)
    kx, kw, kb = jax.random.split(key, 3)

    x = jax.random.normal(kx, (batch, input_size), dtype=jnp.float32)
    # PyTorch Linear init: uniform(-1/sqrt(K), 1/sqrt(K))
    bound = 1.0 / (input_size ** 0.5)
    weight = jax.random.uniform(kw, (hidden_size, input_size),
                                minval=-bound, maxval=bound, dtype=jnp.float32)
    bias = jax.random.uniform(kb, (hidden_size,),
                              minval=-bound, maxval=bound, dtype=jnp.float32)

    # One-time parameter conversion (transpose + pad + bf16 cast), then forward.
    w_p, b_p, meta = prepare_linear_params(weight, bias)
    y = vision_encoder_forward(x, w_p, b_p, **meta)
    y = jax.block_until_ready(y)

    # Correctness check against plain f32 JAX reference.
    y_ref = x @ weight.T + bias
    assert y.shape == (batch, hidden_size)
    # bf16 MXU inputs with f32 accumulation -> loosened tolerance.
    max_err = float(jnp.max(jnp.abs(y - y_ref)))
    assert jnp.allclose(y, y_ref, atol=5e-2, rtol=5e-2), f"max abs err {max_err}"

    print("KERNEL_OK")
</pallas_src>

<mosaic_0001>
module attributes {stable_mosaic.version = 11 : i64} {
  func.func @_linear_kernel_direct(%arg0: i32, %arg1: i32, %arg2: i32, %arg3: memref<16x128xbf16, #tpu.memory_space<vmem>>, %arg4: memref<128x128xbf16, #tpu.memory_space<vmem>>, %arg5: memref<1x128xf32, #tpu.memory_space<vmem>>, %arg6: memref<16x128xf32, #tpu.memory_space<vmem>>) attributes {dimension_semantics = [#tpu.dimension_semantics<parallel>, #tpu.dimension_semantics<parallel>, #tpu.dimension_semantics<arbitrary>], iteration_bounds = array<i64: 1, 1, 1>, scalar_prefetch = 0 : i64, scratch_operands = 0 : i64, tpu.core_type = #tpu.core_type<tc>, window_params = [{transform_indices = @transform_0, window_bounds = array<i64: 16, 128>}, {transform_indices = @transform_1, window_bounds = array<i64: 128, 128>}, {transform_indices = @transform_2, window_bounds = array<i64: 1, 128>}, {transform_indices = @transform_3, window_bounds = array<i64: 16, 128>}]} {
    %c0_i32 = arith.constant 0 : i32
    %0 = arith.cmpi eq, %arg2, %c0_i32 : i32
    %1 = arith.extui %0 : i1 to i32
    %c0_i32_0 = arith.constant 0 : i32
    %2 = arith.cmpi ne, %1, %c0_i32_0 : i32
    scf.if %2 {
      %cst_10 = arith.constant 0.000000e+00 : f32
      %12 = vector.broadcast %cst_10 : f32 to vector<16x128xf32>
      %c0_11 = arith.constant 0 : index
      %c0_12 = arith.constant 0 : index
      %13 = vector.load %arg6[%c0_11, %c0_12] : memref<16x128xf32, #tpu.memory_space<vmem>>, vector<16x128xf32>
      tpu.vector_store %arg6[%c0_11, %c0_12], %12 {strides = array<i32>} : memref<16x128xf32, #tpu.memory_space<vmem>>, vector<16x128xf32>,
    } else {
    }
    %c0 = arith.constant 0 : index
    %c0_1 = arith.constant 0 : index
    %3 = vector.load %arg6[%c0, %c0_1] : memref<16x128xf32, #tpu.memory_space<vmem>>, vector<16x128xf32>
    %c0_2 = arith.constant 0 : index
    %c0_3 = arith.constant 0 : index
    %4 = vector.load %arg3[%c0_2, %c0_3] : memref<16x128xbf16, #tpu.memory_space<vmem>>, vector<16x128xbf16>
    %c0_4 = arith.constant 0 : index
    %c0_5 = arith.constant 0 : index
    %5 = vector.load %arg4[%c0_4, %c0_5] : memref<128x128xbf16, #tpu.memory_space<vmem>>, vector<128x128xbf16>
    %cst = arith.constant dense<0.000000e+00> : vector<16x128xf32>
    %6 = tpu.matmul %4, %5, %cst {dimension_numbers = #tpu.dot_dimension_numbers<[1], [0], [0], [1], [0, 0, 1, 1], [], []>} : vector<16x128xbf16>, vector<128x128xbf16>, vector<16x128xf32> -> vector<16x128xf32>
    %7 = arith.addf %3, %6 : vector<16x128xf32>
    %c0_6 = arith.constant 0 : index
    %c0_7 = arith.constant 0 : index
    %8 = vector.load %arg6[%c0_6, %c0_7] : memref<16x128xf32, #tpu.memory_space<vmem>>, vector<16x128xf32>
    tpu.vector_store %arg6[%c0_6, %c0_7], %7 {strides = array<i32>} : memref<16x128xf32, #tpu.memory_space<vmem>>, vector<16x128xf32>,
    %c0_i32_8 = arith.constant 0 : i32
    %9 = arith.cmpi eq, %arg2, %c0_i32_8 : i32
    %10 = arith.extui %9 : i1 to i32
    %c0_i32_9 = arith.constant 0 : i32
    %11 = arith.cmpi ne, %10, %c0_i32_9 : i32
    scf.if %11 {
      %c0_10 = arith.constant 0 : index
      %c0_11 = arith.constant 0 : index
      %12 = vector.load %arg6[%c0_10, %c0_11] : memref<16x128xf32, #tpu.memory_space<vmem>>, vector<16x128xf32>
      %c0_12 = arith.constant 0 : index
      %c0_13 = arith.constant 0 : index
      %13 = vector.load %arg5[%c0_12, %c0_13] : memref<1x128xf32, #tpu.memory_space<vmem>>, vector<1x128xf32>
      %14 = vector.broadcast %13 : vector<1x128xf32> to vector<16x128xf32>
      %15 = arith.addf %12, %14 : vector<16x128xf32>
      %c0_14 = arith.constant 0 : index
      %c0_15 = arith.constant 0 : index
      %16 = vector.load %arg6[%c0_14, %c0_15] : memref<16x128xf32, #tpu.memory_space<vmem>>, vector<16x128xf32>
      tpu.vector_store %arg6[%c0_14, %c0_15], %15 {strides = array<i32>} : memref<16x128xf32, #tpu.memory_space<vmem>>, vector<16x128xf32>,
    } else {
    }
    return
  }
  func.func @transform_0(%arg0: i32, %arg1: i32, %arg2: i32) -> (i32, i32) {
    %c0_i32 = arith.constant 0 : i32
    return %arg0, %arg2 : i32, i32
  }
  func.func @transform_1(%arg0: i32, %arg1: i32, %arg2: i32) -> (i32, i32) {
    %c0_i32 = arith.constant 0 : i32
    return %arg2, %arg1 : i32, i32
  }
  func.func @transform_2(%arg0: i32, %arg1: i32, %arg2: i32) -> (i32, i32) {
    %c0_i32 = arith.constant 0 : i32
    %c0_i32_0 = arith.constant 0 : i32
    return %c0_i32, %arg1 : i32, i32
  }
  func.func @transform_3(%arg0: i32, %arg1: i32, %arg2: i32) -> (i32, i32) {
    %c0_i32 = arith.constant 0 : i32
    return %arg0, %arg1 : i32, i32
  }
}

</mosaic_0001>

<bundles_post_ra>
// kernel: vision_encoder_forward.1
= control target key start
LH: loop header
LB: loop body
LE: loop exit
PB: predicated region body
PF: predicated region fallthrough
CT: control target
= control target key end

     0   :  { %8 = vsyncpa [#allocation3], 0  ;;  %s250_s12 = smov [#allocation2]   ;;  %s290_s0 = inlined_call_operand.vmem [shape: bf16[16,128], index: 0, kind: input, shape index: {}]   ;;  %s291_s1 = inlined_call_operand.hbm [shape: bf16[128,128], index: 1, kind: input, shape index: {}]   ;;  %s292_s2 = inlined_call_operand.vmem [shape: f32[1,128], index: 2, kind: input, shape index: {}]   ;;  %s293_s3 = inlined_call_operand.vmem [shape: f32[16,128], index: 3, kind: output, shape index: {}]  }
   0x1   :  { %s16_s13 = sshll.u32 %s250_s12, 4  ;;  %s17_s13 = int_to_ptr.vmem [resolvable:$true] %s16_s13 }
   0x2   :  { %s236_s14 = scalar_lea.vmem %s17_s13, 1024  ;;  %p241_p1 = scmp.lt.s32.totalorder %s17_s13, %s17_s13 }
   0x3   :  { %p237_p0 = scmp.ne.s32.totalorder %s17_s13, %s236_s14  ;;  %p242_p2 = scmp.lt.s32.totalorder %s236_s14, %s236_s14 }
   0x5   :  { %p243_p3 = por %p242_p2, %p241_p1 }
   0x7   :  { %p244_p4 = pnand %p243_p3, %p237_p0 }
   0x9   :  { %247 = shalt.err (!%p244_p4)
}
   0xa   :  { %s251_s15 = smov 64   ;;  %s252_s16 = smov 4  }
   0xb   :  { %22 = dma.hbm_to_vmem [thread:$0]  %s291_s1, 1024, %s17_s13, [#allocation3], %s251_s15, %s251_s15, %s252_s16  }
   0xc   :  { %248 = dma.done.wait [#allocation3], 1024  }
   0xd   :  { %249 = vsyncadd [#allocation3], 4294966272  ;;  %v253_v0 = vmov 0.0   ;;  %vm254_vm0 = vmmov 0   ;;  %v219_v1 = vld [vmem:[#allocation2 + $0x38] sm:$0xff]   ;;  %v220_v2 = vld [vmem:[#allocation2 + $0x30] sm:$0xff]  }
   0xe   :  { %194 = vmatprep.subr.bf16.mxu0 %v253_v0  ;;  %210 = vmatprep.mubr.msk.bf16.mxu0 %vm254_vm0, %v253_v0  ;;  %v221_v3 = vld [vmem:[#allocation2 + $0x28] sm:$0xff]   ;;  %v222_v4 = vld [vmem:[#allocation2 + $0x20] sm:$0xff]   ;;  %v223_v5 = vld [vmem:[#allocation2 + $0x18] sm:$0xff]  }
   0xf   :  { %195 = vmatpush3.bf16.msra.mxu0 %v219_v1  ;;  %v224_v6 = vld [vmem:[#allocation2 + $0x10] sm:$0xff]   ;;  %v225_v7 = vld [vmem:[#allocation2 + $0x8] sm:$0xff]   ;;  %v226_v8 = vld [vmem:[#allocation2] sm:$0xff]  }
  0x10   :  { %196 = vmatprep.subr.bf16.mxu0 %v253_v0  ;;  %v227_v9 = vld [vmem:[%s290_s0] sm:$0xff]  }
  0x11   :  { %v184_v11 = vld [vmem:[%s292_s2] ss:$0 sm:$0xff] }
  0x13   :  { %197 = vmatpush3.bf16.msra.mxu0 %v220_v2 }
  0x14   :  { %198 = vmatprep.subr.bf16.mxu0 %v253_v0 }
  0x17   :  { %199 = vmatpush3.bf16.msra.mxu0 %v221_v3 }
  0x18   :  { %200 = vmatprep.subr.bf16.mxu0 %v253_v0 }
  0x1b   :  { %201 = vmatpush3.bf16.msra.mxu0 %v222_v4 }
  0x1c   :  { %202 = vmatprep.subr.bf16.mxu0 %v253_v0 }
  0x1f   :  { %203 = vmatpush3.bf16.msra.mxu0 %v223_v5 }
  0x20   :  { %204 = vmatprep.subr.bf16.mxu0 %v253_v0 }
  0x23   :  { %205 = vmatpush3.bf16.msra.mxu0 %v224_v6 }
  0x24   :  { %206 = vmatprep.subr.bf16.mxu0 %v253_v0 }
  0x27   :  { %207 = vmatpush3.bf16.msra.mxu0 %v225_v7 }
  0x28   :  { %208 = vmatprep.subr.bf16.mxu0 %v253_v0 }
  0x2b   :  { %209 = vmatpush3.bf16.msra.mxu0 %v226_v8 }
  0x2e   :  { %211 = vmatmul.mubr.bf16.vlgmr.msra.gmra.mxu0 %v227_v9 }
  0xee   :  { %v143_v10 = vpop.f32.mrf.mxu0 }
  0xef   :  { %v166_v13 = vadd.f32 %v184_v11, %v143_v10 }
  0xf0   :  { %v212_v12 = vpop.f32.mrf.mxu0 }
  0xf1   :  { %168 = vst [vmem:[%s293_s3] sm:$0xff] %v166_v13 }
  0xf2   :  { %v146_v14 = vpop.f32.mrf.mxu0 }
  0xf3   :  { %v167_v16 = vadd.f32 %v184_v11, %v146_v14 }
  0xf4   :  { %v213_v15 = vpop.f32.mrf.mxu0 }
  0xf5   :  { %169 = vst [vmem:[%s293_s3 + $0x8] sm:$0xff] %v167_v16 }
  0xf6   :  { %174 = vsyncpa [#allocation3], 1 }

</bundles_post_ra>
